<compile_context>
chip_gen: v7x
topology: tpu7x:2x2x1
jax: 0.10.0
libtpu: 0.0.40
codegen_flags: <defaults>
</compile_context>

<pallas_src>
import functools

import jax
import jax.numpy as jnp
from jax import lax
from jax.experimental import pallas as pl
from jax.experimental.pallas import tpu as pltpu

CHUNK = 256      # lane-chunk width inside the kernel (multiple of 128)
TB_MAX = 8192    # max batch tile on the lane axis (multiple of CHUNK)


def _round_up(n, m):
    return ((n + m - 1) // m) * m


def _bf16_activations():
    """bf16 tanh / bf16 MXU inputs only on generations with bf16 VPU/EUP
    (v6e, v7x).  v5e and older keep f32 (bf16 there only adds converts)."""
    try:
        kind = jax.devices()[0].device_kind.lower()
    except Exception:
        return False
    return ("v6" in kind) or ("v7" in kind) or ("7x" in kind)


def _mlp_kernel(x_ref, w1_ref, b1_ref, w2_ref, b2_ref, w3c_ref, b3_ref,
                o_ref, *, act_dtype, chunk):
    # ---- loop-invariant loads, hoisted out of the lane-chunk loop ----------
    w1a = w1_ref[:, 0:1]                       # (64, 1)
    w1b = w1_ref[:, 1:2]                       # (64, 1)
    b1 = b1_ref[...]                           # (64, 1)
    w2 = w2_ref[...].astype(act_dtype)         # (32, 64) MXU stationary operand
    b2 = b2_ref[...]                           # (32, 1)
    w3c = w3c_ref[...]                         # (32, 1)
    b3 = b3_ref[...]                           # (1, 1)

    n_chunks = x_ref.shape[1] // chunk         # static (TB is a multiple of chunk)

    def body(c, carry):
        off = pl.multiple_of(c * chunk, 128)
        x0 = x_ref[0:1, pl.ds(off, chunk)]     # (1, C)  batch on lanes
        x1 = x_ref[1:2, pl.ds(off, chunk)]     # (1, C)

        # Layer 1 (in_features=2): two broadcast FMAs on the VPU (K=2 is not
        # worth a padded MXU push).
        pre1 = w1a * x0 + w1b * x1 + b1                       # (64, C) f32
        h1 = jnp.tanh(pre1.astype(act_dtype))                 # EUP (bf16 on v6e/v7x)

        # Layer 2 (K=64): MXU with f32 accumulation.
        pre2 = jnp.dot(w2, h1, preferred_element_type=jnp.float32) + b2
        h2 = jnp.tanh(pre2.astype(act_dtype))                 # (32, C)

        # Layer 3 (out_features=1): broadcast MAC + sublane reduce on VPU/XLU;
        # keeps the MXU free of an M=1 push.
        out = jnp.sum(w3c * h2.astype(jnp.float32), axis=0, keepdims=True) + b3
        o_ref[0:1, pl.ds(off, chunk)] = out.astype(o_ref.dtype)
        return carry

    lax.fori_loop(0, n_chunks, body, 0, unroll=min(n_chunks, 8))


def arnn_forward(x, params):
    """x: (B, 2) float32 -> (B, 1) float32.  params in PyTorch nn.Linear
    layout: (w1 (64,2), b1 (64,), w2 (32,64), b2 (32,), w3 (1,32), b3 (1,))."""
    w1, b1, w2, b2, w3, b3 = params
    B = x.shape[0]

    # ---- per-call batch tile ------------------------------------------------
    b_ceil = _round_up(B, CHUNK)
    TB = min(TB_MAX, b_ceil)
    if b_ceil >= 2 * CHUNK:
        # Keep >= 2 batch tiles when possible so a 2-TensorCore chip (v7x) can
        # shard the "parallel" grid axis; costs at most one extra grid step
        # (~0.35 us) on single-TC generations.
        TB = min(TB, _round_up(b_ceil // 2, CHUNK))
    n_tiles = pl.cdiv(B, TB)

    # Feature-major relayout: batch on the lane axis.  This transpose is the
    # one remaining extra HBM pass over x; no padding pass for B >= TB (Pallas
    # boundary blocks clamp reads and drop out-of-bounds writes — the tail
    # lanes of the last tile carry undefined data that is never written back).
    x_fm = x.T                                                 # (2, B)
    Bp = B
    if B < TB:                      # tiny batches only: pad lanes to one tile
        Bp = TB
        x_fm = jnp.pad(x_fm, ((0, 0), (0, Bp - B)))

    act_dtype = jnp.bfloat16 if _bf16_activations() else jnp.float32

    b1c = b1.reshape(-1, 1)
    b2c = b2.reshape(-1, 1)
    w3c = w3.reshape(-1, 1)          # (32, 1) column for the VPU layer-3 MAC
    b3c = b3.reshape(1, 1)

    const = lambda a: pl.BlockSpec(a.shape, lambda i: (0, 0))

    out_fm = pl.pallas_call(
        functools.partial(_mlp_kernel, act_dtype=act_dtype, chunk=CHUNK),
        out_shape=jax.ShapeDtypeStruct((1, Bp), jnp.float32),
        grid=(n_tiles,),
        in_specs=[
            pl.BlockSpec((2, TB), lambda i: (0, i)),           # x tile
            const(w1), const(b1c), const(w2), const(b2c), const(w3c), const(b3c),
        ],
        out_specs=pl.BlockSpec((1, TB), lambda i: (0, i)),     # lane-dense out
        compiler_params=pltpu.CompilerParams(
            dimension_semantics=("parallel",),                 # 2-TC sharding on v7x
        ),
    )(x_fm, w1, b1c, w2, b2c, w3c, b3c)

    # (1, Bp) -> (B, 1): drop any lane padding, then a free reshape.
    return out_fm[:, :B].reshape(B, 1)


def init_params(key):
    """PyTorch nn.Linear default init: U(-1/sqrt(fan_in), 1/sqrt(fan_in)),
    weights stored (out_features, in_features), biases (out_features,)."""
    dims = [(2, 64), (64, 32), (32, 1)]
    params = []
    for fan_in, fan_out in dims:
        key, kw, kb = jax.random.split(key, 3)
        bound = 1.0 / (fan_in ** 0.5)
        w = jax.random.uniform(kw, (fan_out, fan_in), jnp.float32, -bound, bound)
        b = jax.random.uniform(kb, (fan_out,), jnp.float32, -bound, bound)
        params += [w, b]
    return tuple(params)


def reference_forward(x, params):
    w1, b1, w2, b2, w3, b3 = params
    h1 = jnp.tanh(x @ w1.T + b1)
    h2 = jnp.tanh(h1 @ w2.T + b2)
    return h2 @ w3.T + b3


if __name__ == "__main__":
    key = jax.random.PRNGKey(0)
    kp, kx = jax.random.split(key)
    params = init_params(kp)

    B = 8
    x = jax.random.normal(kx, (B, 2), jnp.float32)

    out = jax.block_until_ready(arnn_forward(x, params))
    ref = reference_forward(x, params)

    assert out.shape == (B, 1)
    # bf16 tanh / bf16 MXU inputs on v6e/v7x need a looser tolerance.
    tol = 5e-2 if _bf16_activations() else 1e-5
    assert jnp.allclose(out, ref, atol=tol, rtol=tol)

    print("KERNEL_OK")
</pallas_src>

<mosaic_0001>
module attributes {stable_mosaic.version = 11 : i64} {
  func.func @_mlp_kernel(%arg0: i32, %arg1: memref<2x256xf32, #tpu.memory_space<vmem>>, %arg2: memref<64x2xf32, #tpu.memory_space<vmem>>, %arg3: memref<64x1xf32, #tpu.memory_space<vmem>>, %arg4: memref<32x64xf32, #tpu.memory_space<vmem>>, %arg5: memref<32x1xf32, #tpu.memory_space<vmem>>, %arg6: memref<32x1xf32, #tpu.memory_space<vmem>>, %arg7: memref<1x1xf32, #tpu.memory_space<vmem>>, %arg8: memref<1x256xf32, #tpu.memory_space<vmem>>) attributes {dimension_semantics = [#tpu.dimension_semantics<parallel>], iteration_bounds = array<i64: 1>, scalar_prefetch = 0 : i64, scratch_operands = 0 : i64, tpu.core_type = #tpu.core_type<tc>, window_params = [{transform_indices = @transform_0, window_bounds = array<i64: 2, 256>}, {pipeline_mode = #tpu.pipeline_mode<synchronous>, transform_indices = @transform_1, window_bounds = array<i64: 64, 2>}, {pipeline_mode = #tpu.pipeline_mode<synchronous>, transform_indices = @transform_2, window_bounds = array<i64: 64, 1>}, {pipeline_mode = #tpu.pipeline_mode<synchronous>, transform_indices = @transform_3, window_bounds = array<i64: 32, 64>}, {pipeline_mode = #tpu.pipeline_mode<synchronous>, transform_indices = @transform_4, window_bounds = array<i64: 32, 1>}, {pipeline_mode = #tpu.pipeline_mode<synchronous>, transform_indices = @transform_5, window_bounds = array<i64: 32, 1>}, {pipeline_mode = #tpu.pipeline_mode<synchronous>, transform_indices = @transform_6, window_bounds = array<i64: 1, 1>}, {transform_indices = @transform_7, window_bounds = array<i64: 1, 256>}]} {
    %c0 = arith.constant 0 : index
    %c0_0 = arith.constant 0 : index
    %0 = vector.load %arg2[%c0, %c0_0] : memref<64x2xf32, #tpu.memory_space<vmem>>, vector<64x1xf32>
    %c0_1 = arith.constant 0 : index
    %c1 = arith.constant 1 : index
    %1 = vector.load %arg2[%c0_1, %c1] : memref<64x2xf32, #tpu.memory_space<vmem>>, vector<64x1xf32>
    %c0_2 = arith.constant 0 : index
    %c0_3 = arith.constant 0 : index
    %2 = vector.load %arg3[%c0_2, %c0_3] : memref<64x1xf32, #tpu.memory_space<vmem>>, vector<64x1xf32>
    %c0_4 = arith.constant 0 : index
    %c0_5 = arith.constant 0 : index
    %3 = vector.load %arg4[%c0_4, %c0_5] : memref<32x64xf32, #tpu.memory_space<vmem>>, vector<32x64xf32>
    %c0_6 = arith.constant 0 : index
    %c0_7 = arith.constant 0 : index
    %4 = vector.load %arg5[%c0_6, %c0_7] : memref<32x1xf32, #tpu.memory_space<vmem>>, vector<32x1xf32>
    %c0_8 = arith.constant 0 : index
    %c0_9 = arith.constant 0 : index
    %5 = vector.load %arg6[%c0_8, %c0_9] : memref<32x1xf32, #tpu.memory_space<vmem>>, vector<32x1xf32>
    %c0_10 = arith.constant 0 : index
    %c0_11 = arith.constant 0 : index
    %6 = vector.load %arg7[%c0_10, %c0_11] : memref<1x1xf32, #tpu.memory_space<vmem>>, vector<1x1xf32>
    %c0_i32 = arith.constant 0 : i32
    %c256_i32 = arith.constant 256 : i32
    %7 = arith.muli %c0_i32, %c256_i32 : i32
    %8 = tpu.assume_multiple %7, 128 : i32
    %c0_12 = arith.constant 0 : index
    %9 = arith.index_cast %8 : i32 to index
    %10 = vector.load %arg1[%c0_12, %9] : memref<2x256xf32, #tpu.memory_space<vmem>>, vector<1x256xf32>
    %c1_13 = arith.constant 1 : index
    %11 = arith.index_cast %8 : i32 to index
    %12 = vector.load %arg1[%c1_13, %11] : memref<2x256xf32, #tpu.memory_space<vmem>>, vector<1x256xf32>
    %13 = vector.broadcast %0 : vector<64x1xf32> to vector<64x256xf32>
    %14 = vector.broadcast %10 : vector<1x256xf32> to vector<64x256xf32>
    %15 = arith.mulf %13, %14 : vector<64x256xf32>
    %16 = vector.broadcast %1 : vector<64x1xf32> to vector<64x256xf32>
    %17 = vector.broadcast %12 : vector<1x256xf32> to vector<64x256xf32>
    %18 = arith.mulf %16, %17 : vector<64x256xf32>
    %19 = arith.addf %15, %18 : vector<64x256xf32>
    %20 = vector.broadcast %2 : vector<64x1xf32> to vector<64x256xf32>
    %21 = arith.addf %19, %20 : vector<64x256xf32>
    %22 = math.tanh %21 : vector<64x256xf32>
    %cst = arith.constant dense<0.000000e+00> : vector<32x256xf32>
    %23 = tpu.matmul %3, %22, %cst {dimension_numbers = #tpu.dot_dimension_numbers<[1], [0], [0], [1], [0, 0, 1, 1], [], []>} : vector<32x64xf32>, vector<64x256xf32>, vector<32x256xf32> -> vector<32x256xf32>
    %24 = vector.broadcast %4 : vector<32x1xf32> to vector<32x256xf32>
    %25 = arith.addf %23, %24 : vector<32x256xf32>
    %26 = math.tanh %25 : vector<32x256xf32>
    %27 = vector.broadcast %5 : vector<32x1xf32> to vector<32x256xf32>
    %28 = arith.mulf %27, %26 : vector<32x256xf32>
    %cst_14 = arith.constant dense<0.000000e+00> : vector<256xf32>
    %29 = vector.multi_reduction <add>, %28, %cst_14 [0] : vector<32x256xf32> to vector<256xf32>
    %30 = vector.shape_cast %29 : vector<256xf32> to vector<1x256xf32>
    %31 = vector.broadcast %6 : vector<1x1xf32> to vector<1x256xf32>
    %32 = arith.addf %30, %31 : vector<1x256xf32>
    %c0_15 = arith.constant 0 : index
    %33 = arith.index_cast %8 : i32 to index
    %34 = vector.load %arg8[%c0_15, %33] : memref<1x256xf32, #tpu.memory_space<vmem>>, vector<1x256xf32>
    tpu.vector_store %arg8[%c0_15, %33], %32 {strides = array<i32>} : memref<1x256xf32, #tpu.memory_space<vmem>>, vector<1x256xf32>,
    %c1_i32 = arith.constant 1 : i32
    return
  }
  func.func @transform_0(%arg0: i32) -> (i32, i32) {
    %c0_i32 = arith.constant 0 : i32
    %c0_i32_0 = arith.constant 0 : i32
    return %c0_i32, %arg0 : i32, i32
  }
  func.func @transform_1(%arg0: i32) -> (i32, i32) {
    %c0_i32 = arith.constant 0 : i32
    %c0_i32_0 = arith.constant 0 : i32
    %c0_i32_1 = arith.constant 0 : i32
    return %c0_i32, %c0_i32_0 : i32, i32
  }
  func.func @transform_2(%arg0: i32) -> (i32, i32) {
    %c0_i32 = arith.constant 0 : i32
    %c0_i32_0 = arith.constant 0 : i32
    %c0_i32_1 = arith.constant 0 : i32
    return %c0_i32, %c0_i32_0 : i32, i32
  }
  func.func @transform_3(%arg0: i32) -> (i32, i32) {
    %c0_i32 = arith.constant 0 : i32
    %c0_i32_0 = arith.constant 0 : i32
    %c0_i32_1 = arith.constant 0 : i32
    return %c0_i32, %c0_i32_0 : i32, i32
  }
  func.func @transform_4(%arg0: i32) -> (i32, i32) {
    %c0_i32 = arith.constant 0 : i32
    %c0_i32_0 = arith.constant 0 : i32
    %c0_i32_1 = arith.constant 0 : i32
    return %c0_i32, %c0_i32_0 : i32, i32
  }
  func.func @transform_5(%arg0: i32) -> (i32, i32) {
    %c0_i32 = arith.constant 0 : i32
    %c0_i32_0 = arith.constant 0 : i32
    %c0_i32_1 = arith.constant 0 : i32
    return %c0_i32, %c0_i32_0 : i32, i32
  }
  func.func @transform_6(%arg0: i32) -> (i32, i32) {
    %c0_i32 = arith.constant 0 : i32
    %c0_i32_0 = arith.constant 0 : i32
    %c0_i32_1 = arith.constant 0 : i32
    return %c0_i32, %c0_i32_0 : i32, i32
  }
  func.func @transform_7(%arg0: i32) -> (i32, i32) {
    %c0_i32 = arith.constant 0 : i32
    %c0_i32_0 = arith.constant 0 : i32
    return %c0_i32, %arg0 : i32, i32
  }
}

</mosaic_0001>

<bundles_post_ra>
// kernel: tpu_custom_call.1
= control target key start
LH: loop header
LB: loop body
LE: loop exit
PB: predicated region body
PF: predicated region fallthrough
CT: control target
= control target key end

     0   :  { %s829_s0 = inlined_call_operand.vmem [shape: f32[2,256], index: 0, kind: input, shape index: {}]   ;;  %s830_s1 = inlined_call_operand.vmem [shape: f32[64,2], index: 1, kind: input, shape index: {}]   ;;  %s831_s2 = inlined_call_operand.vmem [shape: f32[64,1], index: 2, kind: input, shape index: {}]   ;;  %s832_s3 = inlined_call_operand.vmem [shape: f32[32,64], index: 3, kind: input, shape index: {}]   ;;  %s833_s4 = inlined_call_operand.vmem [shape: f32[32,1], index: 4, kind: input, shape index: {}]   ;;  %s834_s5 = inlined_call_operand.vmem [shape: f32[32,1], index: 5, kind: input, shape index: {}]   ;;  %s835_s6 = inlined_call_operand.<no memory space> [shape: f32[1,1], index: 6, kind: input, shape index: {}]   ;;  %s836_s7 = inlined_call_operand.hbm [shape: f32[1,256], index: 7, kind: output, shape index: {}]  }
   0x1   :  { %v12_v0 = vstv %s835_s6 }
   0x2   :  { %13 = vst [vmem:[#allocation2] sm:$0x1] %v12_v0 }
   0x3   :  { %v31_v1 = vld [vmem:[%s830_s1 + $0x10] sm:$0xff]  ;;  %v29_v2 = vld [vmem:[%s830_s1] sm:$0xff]  ;;  %v615_v3 = vmov 1   ;;  %v30_v5 = vld [vmem:[%s830_s1 + $0x8] sm:$0xff] }
   0x4   :  { %535 = vset.pattern.permute.xlu0 %v615_v3  ;;  %533 = vset.pattern.permute.xlu1 %v615_v3  ;;  %v33_v4 = vld [vmem:[%s830_s1 + $0x20] sm:$0xff]  ;;  %v35_v6 = vld [vmem:[%s830_s1 + $0x30] sm:$0xff]  ;;  %v32_v7 = vld [vmem:[%s830_s1 + $0x18] sm:$0xff] }
   0x5   :  { %137 = vperm.xlu0 %535, %v31_v1   ;;  %129 = vperm.xlu1 %533, %v29_v2  }
   0x9   :  { %145 = vperm.xlu0 %535, %v33_v4   ;;  %133 = vperm.xlu1 %533, %v30_v5  }
   0xa   :  { %14 = vsyncpa [#allocation4], 0  ;;  %v616_v8 = vmov 0   ;;  %v37_v9 = vld [vmem:[%s831_s2] sm:$0xff]  ;;  %v38_v10 = vld [vmem:[%s831_s2 + $0x8] sm:$0xff]  ;;  %v617_v28 = vmov 0.0   ;;  %v102_v31 = vlaneseq }
   0xb   :  { %v34_v11 = vld [vmem:[%s830_s1 + $0x28] sm:$0xff]  ;;  %v40_v12 = vld [vmem:[%s831_s2 + $0x18] sm:$0xff]  ;;  %v49_v14 = vld [vmem:[%s833_s4] sm:$0xff]  ;;  %372 = vmatprep.mubr.f32.mxu0 %v617_v28  ;;  %384 = vmatprep.mubr.f32.mxu1 %v617_v28  ;;  %vm295_vm0 = vcmask 523264  }
   0xc   :  { %v42_v13 = vld [vmem:[%s831_s2 + $0x28] sm:$0xff]  ;;  %v39_v15 = vld [vmem:[%s831_s2 + $0x10] sm:$0xff]  ;;  %v53_v17 = vld [vmem:[%s834_s5] sm:$0xff]  ;;  %v740_v34 = vshrl.u32 %v102_v31, 7  ;;  %vm482_vm1 = vcmp.lt.s32.totalorder %v102_v31, 256 }
   0xd   :  { %153 = vperm.xlu0 %535, %v35_v6   ;;  %534 = vset.pattern.permute.xlu1 %v616_v8  ;;  %v51_v16 = vld [vmem:[%s833_s4 + $0x10] sm:$0xff]  ;;  %v36_v18 = vld [vmem:[%s830_s1 + $0x38] sm:$0xff]  ;;  %v57_v20 = vld [vmem:[#allocation2] sm:$0x1] }
   0xe   :  { %78 = vperm.xlu1 %534, %v32_v7   ;;  %v55_v19 = vld [vmem:[%s834_s5 + $0x10] sm:$0xff]  ;;  %v41_v21 = vld [vmem:[%s831_s2 + $0x20] sm:$0xff]  ;;  %v44_v23 = vld [vmem:[%s831_s2 + $0x38] sm:$0xff]  ;;  %v745_v37 = vsub.s32 0, %v740_v34  ;;  %v108_v38 = vsub.s32 1, %v740_v34 }
   0xf   :  { %v43_v22 = vld [vmem:[%s831_s2 + $0x30] sm:$0xff]  ;;  %v50_v24 = vld [vmem:[%s833_s4 + $0x8] sm:$0xff]  ;;  %v52_v25 = vld [vmem:[%s833_s4 + $0x18] sm:$0xff] }
  0x10   :  { %v54_v26 = vld [vmem:[%s834_s5 + $0x8] sm:$0xff]  ;;  %v56_v27 = vld [vmem:[%s834_s5 + $0x18] sm:$0xff]  ;;  %v499_v39 = vld [vmem:[%s829_s0 + $0x1] ss:$2 sm:$0x3] }
  0x11   :  { %540 = vset.pattern.permute.xlu0 %v616_v8  ;;  %v58_v40 = vld [vmem:[%s829_s0] ss:$2 sm:$0x3]  ;;  %v755_v42 = vrot.slane %v499_v39, %v745_v37  ;;  %v760_v45 = vrot.slane %v499_v39, %v108_v38 }
  0x12   :  { %63 = vperm.xlu0 %540, %v29_v2   ;;  %536 = vset.pattern.permute.xlu1 %v615_v3  ;;  %v758_v43 = vrot.slane %v58_v40, %v745_v37  ;;  %v762_v46 = vrot.slane %v58_v40, %v108_v38 }
  0x13   :  { %141 = vperm.xlu1 %536, %v32_v7  }
  0x16   :  { %68 = vperm.xlu0 %540, %v30_v5  }
  0x17   :  { %537 = vset.pattern.permute.xlu1 %v616_v8 }
  0x18   :  { %205 = vperm.xlu1 %537, %v37_v9  }
  0x1a   :  { %73 = vperm.xlu0 %540, %v31_v1  }
  0x1c   :  { %83 = vperm.xlu1 %537, %v33_v4  }
  0x1e   :  { %210 = vperm.xlu0 %540, %v38_v10  }
  0x20   :  { %88 = vperm.xlu1 %537, %v34_v11  }
  0x22   :  { %220 = vperm.xlu0 %540, %v40_v12  }
  0x24   :  { %538 = vset.pattern.permute.xlu1 %v615_v3 }
  0x25   :  { %149 = vperm.xlu1 %538, %v34_v11  }
  0x26   :  { %230 = vperm.xlu0 %540, %v42_v13  }
  0x29   :  { %539 = vset.pattern.permute.xlu1 %v616_v8 }
  0x2a   :  { %277 = vperm.xlu0 %540, %v49_v14   ;;  %215 = vperm.xlu1 %539, %v39_v15  }
  0x2e   :  { %287 = vperm.xlu0 %540, %v51_v16   ;;  %93 = vperm.xlu1 %539, %v35_v6  }
  0x32   :  { %407 = vperm.xlu0 %540, %v53_v17   ;;  %98 = vperm.xlu1 %539, %v36_v18  }
  0x36   :  { %417 = vperm.xlu0 %540, %v55_v19   ;;  %541 = vset.pattern.permute.xlu1 %v615_v3 }
  0x37   :  { %157 = vperm.xlu1 %541, %v36_v18  }
  0x3a   :  { %453 = vperm.xlu0 %540, %v57_v20  }
  0x3b   :  { %542 = vset.pattern.permute.xlu1 %v616_v8 }
  0x3c   :  { %225 = vperm.xlu1 %542, %v41_v21  }
  0x40   :  { %235 = vperm.xlu1 %542, %v43_v22  }
  0x44   :  { %240 = vperm.xlu1 %542, %v44_v23  }
  0x48   :  { %282 = vperm.xlu1 %542, %v50_v24  }
  0x4c   :  { %292 = vperm.xlu1 %542, %v52_v25  }
  0x50   :  { %412 = vperm.xlu1 %542, %v54_v26  }
  0x54   :  { %422 = vperm.xlu1 %542, %v56_v27  }
  0x84   :  { %v130_v29 = vpop.permute.xlu1 %129  ;;  %v138_v30 = vpop.permute.xlu0 %137 }
  0x85   :  { %v171_v50 = vmul.f32 %v755_v42, %v130_v29  ;;  %v172_v51 = vmul.f32 %v760_v45, %v130_v29  ;;  %v175_v7 = vmul.f32 %v755_v42, %v138_v30  ;;  %v176_v9 = vmul.f32 %v760_v45, %v138_v30 }
  0x88   :  { %v134_v32 = vpop.permute.xlu1 %133  ;;  %v737_v33 = vpop.permute.xlu0 %145 }
  0x89   :  { %v173_v58 = vmul.f32 %v755_v42, %v134_v32  ;;  %v174_v59 = vmul.f32 %v760_v45, %v134_v32 }
  0x8c   :  { %v742_v35 = vpop.permute.xlu0 %153 }
  0x8d   :  { %v79_v36 = vpop.permute.xlu1 %78 }
  0x8e   :  { %v118_v8 = vmul.f32 %v758_v43, %v79_v36  ;;  %v119_v10 = vmul.f32 %v762_v46, %v79_v36 }
  0x91   :  { %v64_v41 = vpop.permute.xlu0 %63 }
  0x92   :  { %v142_v44 = vpop.permute.xlu1 %141  ;;  %v112_v47 = vmul.f32 %v758_v43, %v64_v41  ;;  %v113_v48 = vmul.f32 %v762_v46, %v64_v41 }
  0x93   :  { %v177_v5 = vmul.f32 %v755_v42, %v142_v44  ;;  %v178_v6 = vmul.f32 %v760_v45, %v142_v44 }
  0x94   :  { %v187_v55 = vadd.f32 %v171_v50, %v112_v47  ;;  %v188_v56 = vadd.f32 %v172_v51, %v113_v48  ;;  %v179_v50 = vmul.f32 %v755_v42, %v737_v33  ;;  %v180_v51 = vmul.f32 %v760_v45, %v737_v33 }
  0x95   :  { %v69_v49 = vpop.permute.xlu0 %68  ;;  %v193_v15 = vadd.f32 %v177_v5, %v118_v8  ;;  %v194_v16 = vadd.f32 %v178_v6, %v119_v10  ;;  %v184_v5 = vmul.f32 %v760_v45, %v742_v35 }
  0x96   :  { %v114_v53 = vmul.f32 %v758_v43, %v69_v49  ;;  %v115_v54 = vmul.f32 %v762_v46, %v69_v49 }
  0x97   :  { %v206_v52 = vpop.permute.xlu1 %205 }
  0x98   :  { %v243_v60 = vadd.f32 %v206_v52, %v187_v55  ;;  %v244_v61 = vadd.f32 %v206_v52, %v188_v56  ;;  %v189_v63 = vadd.f32 %v173_v58, %v114_v53  ;;  %v190_v0 = vadd.f32 %v174_v59, %v115_v54 }
  0x99   :  { %v74_v57 = vpop.permute.xlu0 %73 }
  0x9a   :  { %543 = vtanh.f32 %v243_v60  ;;  %v116_v11 = vmul.f32 %v758_v43, %v74_v57  ;;  %v117_v12 = vmul.f32 %v762_v46, %v74_v57 }
  0x9b   :  { %v84_v62 = vpop.permute.xlu1 %83  ;;  %545 = vtanh.f32 %v244_v61 }
  0x9c   :  { %v191_v20 = vadd.f32 %v175_v7, %v116_v11  ;;  %v192_v21 = vadd.f32 %v176_v9, %v117_v12  ;;  %v120_v52 = vmul.f32 %v758_v43, %v84_v62  ;;  %v121_v53 = vmul.f32 %v762_v46, %v84_v62 }
  0x9d   :  { %v211_v1 = vpop.permute.xlu0 %210  ;;  %v183_v62 = vmul.f32 %v755_v42, %v742_v35 }
  0x9e   :  { %v245_v2 = vadd.f32 %v211_v1, %v189_v63  ;;  %v246_v3 = vadd.f32 %v211_v1, %v190_v0  ;;  %v195_v0 = vadd.f32 %v179_v50, %v120_v52  ;;  %v196_v1 = vadd.f32 %v180_v51, %v121_v53 }
  0x9f   :  { %v89_v4 = vpop.permute.xlu1 %88 }
  0xa0   :  { %547 = vtanh.f32 %v245_v2  ;;  %v122_v40 = vmul.f32 %v758_v43, %v89_v4  ;;  %v123_v41 = vmul.f32 %v762_v46, %v89_v4 }
  0xa1   :  { %549 = vtanh.f32 %v246_v3  ;;  %v221_v13 = vpop.permute.xlu0 %220 }
  0xa2   :  { %v249_v17 = vadd.f32 %v221_v13, %v193_v15  ;;  %v250_v19 = vadd.f32 %v221_v13, %v194_v16 }
  0xa4   :  { %v150_v14 = vpop.permute.xlu1 %149  ;;  %v544_v18 = vpop.eup %543  ;;  %551 = vtanh.f32 %v249_v17 }
  0xa5   :  { %v546_v22 = vpop.eup %545  ;;  %553 = vtanh.f32 %v250_v19  ;;  %v181_v36 = vmul.f32 %v755_v42, %v150_v14  ;;  %v182_v38 = vmul.f32 %v760_v45, %v150_v14  ;;  %v231_v56 = vpop.permute.xlu0 %230 }
  0xa7   :  { %v197_v44 = vadd.f32 %v181_v36, %v122_v40  ;;  %v198_v48 = vadd.f32 %v182_v38, %v123_v41 }
  0xa9   :  { %v216_v23 = vpop.permute.xlu1 %215  ;;  %v253_v58 = vadd.f32 %v231_v56, %v197_v44  ;;  %v254_v60 = vadd.f32 %v231_v56, %v198_v48  ;;  %v278_v36 = vpop.permute.xlu0 %277 }
  0xaa   :  { %v548_v24 = vpop.eup %547  ;;  %v247_v25 = vadd.f32 %v216_v23, %v191_v20  ;;  %v248_v26 = vadd.f32 %v216_v23, %v192_v21 }
  0xab   :  { %v550_v27 = vpop.eup %549  ;;  %v506_v29 = vpack.c.bf16 %v548_v24, %v544_v18 }
  0xac   :  { %v504_v30 = vpack.c.bf16 %v550_v27, %v546_v22  ;;  %555 = vtanh.f32 %v247_v25  ;;  %v45_v27 = vld [vmem:[%s832_s3] sm:$0xff] }
  0xad   :  { %v94_v32 = vpop.permute.xlu1 %93  ;;  %557 = vtanh.f32 %v248_v26 }
  0xae   :  { %505 = vmatprep.subr.bf16.mxu0 %v504_v30  ;;  %520 = vmatprep.subr.bf16.mxu1 %v504_v30  ;;  %v552_v47 = vpop.eup %551  ;;  %v124_v63 = vmul.f32 %v758_v43, %v94_v32  ;;  %v125_v2 = vmul.f32 %v762_v46, %v94_v32  ;;  %559 = vtanh.f32 %v253_v58  ;;  %v46_v30 = vld [vmem:[%s832_s3 + $0x8] sm:$0xff]  ;;  %v48_v32 = vld [vmem:[%s832_s3 + $0x18] sm:$0xff] }
  0xaf   :  { %507 = vmatpush1.bf16.msra.mxu0 %v506_v29  ;;  %524 = vmatpush1.bf16.msra.mxu1 %v506_v29  ;;  %v554_v49 = vpop.eup %553  ;;  %561 = vtanh.f32 %v254_v60  ;;  %v47_v29 = vld [vmem:[%s832_s3 + $0x10] sm:$0xff]  ;;  %s619_s3 = smov [#allocation3]  }
  0xb0   :  { %v199_v8 = vadd.f32 %v183_v62, %v124_v63  ;;  %v200_v9 = vadd.f32 %v184_v5, %v125_v2  ;;  %s491_s6 = sshll.u32 %s619_s3, 4  ;;  %s492_s6 = int_to_ptr.vmem [resolvable:$true] %s491_s6 }
  0xb1   :  { %v99_v39 = vpop.permute.xlu1 %98  ;;  %s591_s10 = scalar_lea.vmem %s492_s6, 32  ;;  %p596_p1 = scmp.lt.s32.totalorder %s492_s6, %s492_s6 }
  0xb2   :  { %v126_v11 = vmul.f32 %v758_v43, %v99_v39  ;;  %v127_v12 = vmul.f32 %v762_v46, %v99_v39  ;;  %v288_v39 = vpop.permute.xlu0 %287  ;;  %p592_p0 = scmp.ne.s32.totalorder %s492_s6, %s591_s10  ;;  %p597_p2 = scmp.lt.s32.totalorder %s591_s10, %s591_s10 }
  0xb4   :  { %p598_p3 = por %p597_p2, %p596_p1 }
  0xb6   :  { %v158_v54 = vpop.permute.xlu1 %157  ;;  %v556_v55 = vpop.eup %555  ;;  %p599_p4 = pnand %p598_p3, %p592_p0 }
  0xb7   :  { %v558_v57 = vpop.eup %557  ;;  %v510_v59 = vpack.c.bf16 %v552_v47, %v556_v55  ;;  %v185_v6 = vmul.f32 %v755_v42, %v158_v54  ;;  %v186_v7 = vmul.f32 %v760_v45, %v158_v54 }
  0xb8   :  { %v508_v61 = vpack.c.bf16 %v554_v49, %v558_v57  ;;  %v560_v42 = vpop.eup %559 }
  0xb9   :  { %v201_v15 = vadd.f32 %v185_v6, %v126_v11  ;;  %v202_v16 = vadd.f32 %v186_v7, %v127_v12  ;;  %v562_v45 = vpop.eup %561 }
  0xba   :  { %509 = vmatprep.subr.bf16.mxu0 %v508_v61  ;;  %521 = vmatprep.subr.bf16.mxu1 %v508_v61  ;;  %v408_v61 = vpop.permute.xlu0 %407 }
  0xbb   :  { %v226_v33 = vpop.permute.xlu1 %225  ;;  %511 = vmatpush1.bf16.msra.mxu0 %v510_v59  ;;  %525 = vmatpush1.bf16.msra.mxu1 %v510_v59 }
  0xbc   :  { %v251_v3 = vadd.f32 %v226_v33, %v195_v0  ;;  %v252_v4 = vadd.f32 %v226_v33, %v196_v1 }
  0xbe   :  { %563 = vtanh.f32 %v251_v3  ;;  %v418_v6 = vpop.permute.xlu0 %417 }
  0xbf   :  { %565 = vtanh.f32 %v252_v4  ;;  %v236_v10 = vpop.permute.xlu1 %235 }
  0xc0   :  { %v255_v13 = vadd.f32 %v236_v10, %v199_v8  ;;  %v256_v14 = vadd.f32 %v236_v10, %v200_v9 }
  0xc2   :  { %567 = vtanh.f32 %v255_v13 }
  0xc3   :  { %v241_v17 = vpop.permute.xlu1 %240  ;;  %569 = vtanh.f32 %v256_v14 }
  0xc4   :  { %v257_v35 = vadd.f32 %v241_v17, %v201_v15  ;;  %v258_v18 = vadd.f32 %v241_v17, %v202_v16 }
  0xc6   :  { %571 = vtanh.f32 %v257_v35 }
  0xc7   :  { %573 = vtanh.f32 %v258_v18  ;;  %v283_v38 = vpop.permute.xlu1 %282 }
  0xc8   :  { %v564_v19 = vpop.eup %563 }
  0xc9   :  { %v566_v20 = vpop.eup %565  ;;  %v514_v21 = vpack.c.bf16 %v560_v42, %v564_v19 }
  0xca   :  { %v512_v22 = vpack.c.bf16 %v562_v45, %v566_v20 }
  0xcb   :  { %v293_v51 = vpop.permute.xlu1 %292 }
  0xcc   :  { %513 = vmatprep.subr.bf16.mxu0 %v512_v22  ;;  %522 = vmatprep.subr.bf16.mxu1 %v512_v22  ;;  %v568_v43 = vpop.eup %567 }
  0xcd   :  { %515 = vmatpush1.bf16.msra.mxu0 %v514_v21  ;;  %526 = vmatpush1.bf16.msra.mxu1 %v514_v21  ;;  %v570_v46 = vpop.eup %569 }
  0xcf   :  { %v413_v1 = vpop.permute.xlu1 %412 }
  0xd0   :  { %v572_v23 = vpop.eup %571 }
  0xd1   :  { %v574_v24 = vpop.eup %573  ;;  %v518_v25 = vpack.c.bf16 %v572_v23, %v568_v43  ;;  %v618_v23 = vmov 1966171168  }
  0xd2   :  { %v516_v26 = vpack.c.bf16 %v574_v24, %v570_v46  ;;  %v466_v24 = vunpack.c.l.s4 %v618_v23 }
  0xd3   :  { %v423_v12 = vpop.permute.xlu1 %422 }
  0xd4   :  { %517 = vmatprep.subr.bf16.mxu0 %v516_v26  ;;  %523 = vmatprep.subr.bf16.mxu1 %v516_v26 }
  0xd5   :  { %519 = vmatpush1.bf16.msra.mxu0 %v518_v25  ;;  %527 = vmatpush1.bf16.msra.mxu1 %v518_v25  ;;  %v454_v25 = vpop.permute.xlu0 %453 }
  0xd8   :  { %500 = vmatmul.mubr.msk.f32.vlgmr.msra.gmra.mrb[0].mxu0 %vm295_vm0, %v45_v27  ;;  %502 = vmatmul.mubr.msk.f32.vlgmr.msra.gmra.mrb[0].mxu1 %vm295_vm0, %v47_v29  ;;  %v459_v29 = vrot.slane %v454_v25, %v745_v37 }
  0xd9   :  { %378 = vmatprep.mubr.f32.mxu0 %v617_v28  ;;  %390 = vmatprep.mubr.f32.mxu1 %v617_v28 }
  0xdc   :  { %501 = vmatmul.mubr.msk.f32.gmra.mrb[2].mxu0 %vm295_vm0, %v46_v30  ;;  %503 = vmatmul.mubr.msk.f32.gmra.mrb[2].mxu1 %vm295_vm0, %v48_v32 }
 0x1ab   :  { %v374_v40 = vpop.f32.mrb[0].mxu0  ;;  %v386_v41 = vpop.f32.mrb[0].mxu1 }
 0x1ac   :  { %v375_v44 = vadd.f32 %v374_v40, %v278_v36  ;;  %v387_v47 = vadd.f32 %v386_v41, %v288_v39  ;;  %v376_v48 = vpop.f32.mrb[1].mxu0  ;;  %v388_v49 = vpop.f32.mrb[1].mxu1 }
 0x1ad   :  { %v377_v28 = vadd.f32 %v376_v48, %v278_v36  ;;  %v389_v50 = vadd.f32 %v388_v49, %v288_v39  ;;  %v467_v36 = vunpack.c.0.s8 %v466_v24 }
 0x1ae   :  { %575 = vtanh.f32 %v375_v44 }
 0x1af   :  { %577 = vtanh.f32 %v387_v47  ;;  %v380_v52 = vpop.f32.mrb[2].mxu0  ;;  %v392_v53 = vpop.f32.mrb[2].mxu1  ;;  %v470_v41 = vsub.s32 %v467_v36, %v740_v34 }
 0x1b0   :  { %579 = vtanh.f32 %v377_v28  ;;  %v381_v54 = vadd.f32 %v380_v52, %v283_v38  ;;  %v393_v55 = vadd.f32 %v392_v53, %v293_v51  ;;  %v382_v56 = vpop.f32.mrb[3].mxu0  ;;  %v394_v57 = vpop.f32.mrb[3].mxu1 }
 0x1b1   :  { %581 = vtanh.f32 %v389_v50  ;;  %v383_v58 = vadd.f32 %v382_v56, %v283_v38  ;;  %v395_v59 = vadd.f32 %v394_v57, %v293_v51 }
 0x1b2   :  { %583 = vtanh.f32 %v381_v54 }
 0x1b3   :  { %585 = vtanh.f32 %v393_v55 }
 0x1b4   :  { %587 = vtanh.f32 %v383_v58 }
 0x1b5   :  { %589 = vtanh.f32 %v395_v59 }
 0x1b8   :  { %v576_v60 = vpop.eup %575 }
 0x1b9   :  { %v578_v63 = vpop.eup %577  ;;  %v425_v3 = vmul.f32 %v576_v60, %v408_v61 }
 0x1ba   :  { %v580_v0 = vpop.eup %579  ;;  %v429_v7 = vmul.f32 %v578_v63, %v418_v6 }
 0x1bb   :  { %v582_v2 = vpop.eup %581  ;;  %v426_v8 = vmul.f32 %v580_v0, %v408_v61 }
 0x1bc   :  { %v584_v33 = vpop.eup %583  ;;  %v430_v13 = vmul.f32 %v582_v2, %v418_v6 }
 0x1bd   :  { %v586_v62 = vpop.eup %585  ;;  %v427_v4 = vmul.f32 %v584_v33, %v413_v1 }
 0x1be   :  { %v588_v5 = vpop.eup %587  ;;  %v431_v14 = vmul.f32 %v586_v62, %v423_v12 }
 0x1bf   :  { %v433_v9 = vadd.f32 %v427_v4, %v425_v3  ;;  %v428_v10 = vmul.f32 %v588_v5, %v413_v1  ;;  %v590_v11 = vpop.eup %589 }
 0x1c0   :  { %v432_v35 = vmul.f32 %v590_v11, %v423_v12 }
 0x1c1   :  { %v434_v15 = vadd.f32 %v433_v9, %v429_v7  ;;  %v442_v16 = vadd.f32 %v428_v10, %v426_v8 }
 0x1c3   :  { %v435_v17 = vadd.f32 %v434_v15, %v431_v14  ;;  %v443_v18 = vadd.f32 %v442_v16, %v430_v13 }
 0x1c5   :  { %v436_v42 = vrot.slane %v435_v17, 4  ;;  %v444_v45 = vadd.f32 %v443_v18, %v432_v35 }
 0x1c7   :  { %v445_v19 = vrot.slane %v444_v45, 4  ;;  %v437_v20 = vadd.f32 %v436_v42, %v435_v17 }
 0x1c9   :  { %v438_v21 = vrot.slane %v437_v20, 2  ;;  %v446_v22 = vadd.f32 %v445_v19, %v444_v45 }
 0x1cb   :  { %v439_v43 = vadd.f32 %v438_v21, %v437_v20  ;;  %v447_v46 = vrot.slane %v446_v22, 2 }
 0x1cd   :  { %v440_v26 = vrot.slane %v439_v43, 1  ;;  %v448_v27 = vadd.f32 %v447_v46, %v446_v22 }
 0x1cf   :  { %v441_v30 = vadd.f32 %v440_v26, %v439_v43  ;;  %v449_v32 = vrot.slane %v448_v27, 1 }
 0x1d1   :  { %v450_v38 = vadd.f32 %v449_v32, %v448_v27  ;;  %v460_v39 = vadd.f32 %v459_v29, %v441_v30 }
 0x1d3   :  { %v461_v40 = vadd.f32 %v459_v29, %v450_v38 }
 0x1d5   :  { %v464_v44 = vcombine.low %v460_v39, %v461_v40 }
 0x1d7   :  { %v471_v47 = vrot.slane %v464_v44, %v470_v41 }
 0x1d9   :  { %v478_v48 = vrot.slane %v471_v47, %v470_v41 }
 0x1db   :  { %484 = vst.msk [vmem:[#allocation3] sm:$0x3] %vm482_vm1, %v478_v48 }
 0x1dc   :  { %602 = shalt.err (!%p599_p4)
}
 0x1dd   :  { %s603_s13 = scalar_lea.hbm %s836_s7, 32 }
 0x1de   :  { %p604_p5 = scmp.ne.s32.totalorder %s836_s7, %s603_s13  ;;  %p607_p6 = scmp.lt.u32.totalorder %s603_s13, %s836_s7 }
 0x1e0   :  { %p609_p7 = pnand %p607_p6, %p604_p5 }
 0x1e2   :  { %612 = shalt.err (!%p609_p7)
}
 0x1e3   :  { %494 = dma.vmem_to_hbm [thread:$0]  %s492_s6, 32, %s836_s7, [#allocation4]  }
 0x1e4   :  { %613 = dma.done.wait [#allocation4], 32  }
 0x1e5   :  { %614 = vsyncadd [#allocation4], 4294967264 }
 0x1e6   :  { %498 = vsyncpa [#allocation4], 1 }

</bundles_post_ra>
